<compile_context>
chip_gen: v7x
topology: tpu7x:2x2x1
jax: 0.10.0
libtpu: 0.0.40
codegen_flags: <defaults>
</compile_context>

<pallas_src>
import functools
import math

import jax
import jax.numpy as jnp
from jax.experimental import pallas as pl
from jax.experimental.pallas import tpu as pltpu


def _drop_path_kernel(scale_ref, x_ref, o_ref):
    # scale_ref: SMEM f32[B] -- per-sample mask already divided by keep_prob
    # x_ref / o_ref: VMEM tile (1, TR, LANE) of sample b
    b = pl.program_id(0)
    s = scale_ref[b].astype(x_ref.dtype)
    o_ref[...] = x_ref[...] * s


def drop_path(x, drop_prob, key, training=True):
    """Pallas DropPath. Matches torch semantics: identity if drop_prob == 0 or eval."""
    if drop_prob is None or drop_prob == 0.0 or not training:
        return x
    keep_prob = 1.0 - drop_prob
    B = x.shape[0]
    N = math.prod(x.shape[1:])

    # Per-sample uniform draw + mask/scale computed once, in float32, so the
    # keep-probability threshold is unbiased even for bf16/fp8 inputs.
    rand = jax.random.uniform(key, (B,), dtype=jnp.float32)
    scale = jnp.floor(keep_prob + rand) / keep_prob  # f32[B], values in {0, 1/keep_prob}

    # Lane-dense retiling: view each sample as (R, LANE), LANE % 128 == 0.
    LANE = 512 if N >= 512 else 128
    itemsize = jnp.dtype(x.dtype).itemsize
    # ~2 MiB per block -> 2x input + 2x output double-buffering stays well
    # inside the scoped VMEM budget on every generation (incl. v7x 64 MiB).
    target_rows = max(8, (2 * 1024 * 1024) // (LANE * itemsize))
    target_rows = (target_rows // 8) * 8  # sublane multiple

    rows_needed = pl.cdiv(N, LANE)
    if rows_needed <= target_rows:
        # One chunk per sample: block second-to-last dim equals the full dim,
        # so no divisibility-by-8 padding is required.
        tr = rows_needed
        rows_padded = rows_needed
    else:
        tr = target_rows
        rows_padded = pl.cdiv(rows_needed, tr) * tr

    n_padded = rows_padded * LANE
    x_flat = x.reshape(B, N)
    if n_padded != N:
        x_flat = jnp.pad(x_flat, ((0, 0), (0, n_padded - N)))
    x3 = x_flat.reshape(B, rows_padded, LANE)

    grid = (B, rows_padded // tr)
    block = (1, tr, LANE)
    index_map = lambda b, r: (b, r, 0)

    # Note: a further ~drop_prob fraction of input reads could be skipped for
    # dropped samples via scalar prefetch + manual DMA; not worth the
    # complexity at typical drop rates.
    out3 = pl.pallas_call(
        _drop_path_kernel,
        grid=grid,
        in_specs=[
            pl.BlockSpec(memory_space=pltpu.MemorySpace.SMEM),  # scale (B,) f32
            pl.BlockSpec(block, index_map),                     # x tile
        ],
        out_specs=pl.BlockSpec(block, index_map),
        out_shape=jax.ShapeDtypeStruct((B, rows_padded, LANE), x.dtype),
        compiler_params=pltpu.CompilerParams(
            dimension_semantics=("parallel", "parallel"),
            vmem_limit_bytes=32 * 1024 * 1024,
        ),
    )(scale, x3)

    out_flat = out3.reshape(B, n_padded)
    if n_padded != N:
        out_flat = out_flat[:, :N]
    return out_flat.reshape(x.shape)


def _drop_path_ref(x, drop_prob, key):
    """Pure-JAX reference with identical RNG draw / math, for verification."""
    keep_prob = 1.0 - drop_prob
    B = x.shape[0]
    rand = jax.random.uniform(key, (B,), dtype=jnp.float32)
    scale = jnp.floor(keep_prob + rand) / keep_prob
    scale = scale.astype(x.dtype).reshape((B,) + (1,) * (x.ndim - 1))
    return x * scale


if __name__ == "__main__":
    key = jax.random.PRNGKey(0)
    k_x, k_drop = jax.random.split(key)

    B, C, H, W = 2, 4, 16, 16
    x = jax.random.normal(k_x, (B, C, H, W), dtype=jnp.float32)
    drop_prob = 0.3

    # training mode: kernel applies per-sample mask + 1/keep_prob scaling
    out = drop_path(x, drop_prob, k_drop, training=True)
    out = jax.block_until_ready(out)

    ref = _drop_path_ref(x, drop_prob, k_drop)
    assert out.shape == x.shape and out.dtype == x.dtype
    assert jnp.max(jnp.abs(out - ref)) < 1e-6

    # eval mode: identity (matches `not self.training` branch)
    out_eval = drop_path(x, drop_prob, k_drop, training=False)
    out_eval = jax.block_until_ready(out_eval)
    assert jnp.array_equal(out_eval, x)

    print("KERNEL_OK")
</pallas_src>

<mosaic_0001>
module attributes {stable_mosaic.version = 11 : i64} {
  func.func @_drop_path_kernel(%arg0: i32, %arg1: i32, %arg2: memref<2xf32, #tpu.memory_space<smem>>, %arg3: memref<1x2x512xf32, #tpu.memory_space<vmem>>, %arg4: memref<1x2x512xf32, #tpu.memory_space<vmem>>) attributes {dimension_semantics = [#tpu.dimension_semantics<parallel>, #tpu.dimension_semantics<parallel>], iteration_bounds = array<i64: 2, 1>, scalar_prefetch = 0 : i64, scratch_operands = 0 : i64, tpu.core_type = #tpu.core_type<tc>, window_params = [{transform_indices = @transform_0, window_bounds = array<i64: 2>}, {transform_indices = @transform_1, window_bounds = array<i64: 1, 2, 512>}, {transform_indices = @transform_2, window_bounds = array<i64: 1, 2, 512>}]} {
    %0 = arith.index_cast %arg0 : i32 to index
    %1 = memref.load %arg2[%0] : memref<2xf32, #tpu.memory_space<smem>>
    %c0 = arith.constant 0 : index
    %c0_0 = arith.constant 0 : index
    %c0_1 = arith.constant 0 : index
    %2 = vector.load %arg3[%c0, %c0_0, %c0_1] : memref<1x2x512xf32, #tpu.memory_space<vmem>>, vector<1x2x512xf32>
    %3 = vector.broadcast %1 : f32 to vector<1x2x512xf32>
    %4 = arith.mulf %2, %3 : vector<1x2x512xf32>
    %c0_2 = arith.constant 0 : index
    %c0_3 = arith.constant 0 : index
    %c0_4 = arith.constant 0 : index
    %5 = vector.load %arg4[%c0_2, %c0_3, %c0_4] : memref<1x2x512xf32, #tpu.memory_space<vmem>>, vector<1x2x512xf32>
    tpu.vector_store %arg4[%c0_2, %c0_3, %c0_4], %4 {strides = array<i32>} : memref<1x2x512xf32, #tpu.memory_space<vmem>>, vector<1x2x512xf32>,
    return
  }
  func.func @transform_0(%arg0: i32, %arg1: i32) -> i32 {
    %c0_i32 = arith.constant 0 : i32
    %c0_i32_0 = arith.constant 0 : i32
    return %c0_i32 : i32
  }
  func.func @transform_1(%arg0: i32, %arg1: i32) -> (i32, i32, i32) {
    %c0_i32 = arith.constant 0 : i32
    %c0_i32_0 = arith.constant 0 : i32
    return %arg0, %arg1, %c0_i32 : i32, i32, i32
  }
  func.func @transform_2(%arg0: i32, %arg1: i32) -> (i32, i32, i32) {
    %c0_i32 = arith.constant 0 : i32
    %c0_i32_0 = arith.constant 0 : i32
    return %arg0, %arg1, %c0_i32 : i32, i32, i32
  }
}

</mosaic_0001>

<bundles_post_ra>
// kernel: tpu_custom_call.1
= control target key start
LH: loop header
LB: loop body
LE: loop exit
PB: predicated region body
PF: predicated region fallthrough
CT: control target
= control target key end

     0   :  { %7 = vsyncpa [#allocation5], 0  ;;  %s776_s0 = inlined_call_operand.hbm [shape: f32[2], index: 0, kind: input, shape index: {}]   ;;  %s777_s1 = inlined_call_operand.hbm [shape: f32[2,2,512], index: 1, kind: input, shape index: {}]   ;;  %s778_s2 = inlined_call_operand.hbm [shape: f32[2,2,512], index: 2, kind: output, shape index: {}]  }
   0x1   :  { %8 = vsyncpa [#allocation3], 0 }
   0x2   :  { %10 = vsyncpa [#allocation3 + $0x1], 0 }
   0x3   :  { %11 = vsyncpa [#allocation4], 0 }
   0x4   :  { %13 = vsyncpa [#allocation4 + $0x1], 0  ;;  %s549_s9 = smov 0   ;;  %s551_s10 = smov 0  }
   0x5   :  { %s553_s11 = smov 0   ;;  %s555_s12 = smov 0  }
   0x6   :  { %s557_s13 = smov 0   ;;  %s559_s14 = smov 0  }
   0x7 LB: > { %s308_s15 = sadd.s32 4294967295, %s529_s14   ;;  %s309_s16 = sadd.s32 4294967294, %s529_s14   ;;  %s529_s14 = sphi %s559_s14, %s19_s14   ;;  %s525_s13 = sphi %s557_s13, %s802_s13   ;;  %s521_s12 = sphi %s555_s12, %s801_s12   ;;  %s517_s11 = sphi %s553_s11, %s800_s11   ;;  %s513_s10 = sphi %s551_s10, %s799_s10   ;;  %s509_s9 = sphi %s549_s9, %s798_s9  }
   0x8   : > { %p74_p0 = scmp.ne.s32.totalorder %s513_s10, %s509_s9  ;;  %p583_p1 = scmp.eq.s32.totalorder %s308_s15, 0 }
   0x9   : > { %p587_p2 = scmp.eq.s32.totalorder %s308_s15, 1  ;;  %p106_p3 = scmp.eq.s32.totalorder %s309_s16, 1 }
   0xa   : > { %s783_s17 = scalar_select %p583_p1, 1, 0 }
   0xb   : > { %p593_p4 = por %p583_p1, %p74_p0  ;;  %p310_p5 = scmp.ge.s32.totalorder %s529_s14, 1 }
   0xc   : > { %p598_p6 = por %p106_p3, %p74_p0  ;;  %p113_p7 = scmp.lt.s32.totalorder %s529_s14, 3 }
   0xd   : > { %s785_s19 = scalar_select %p593_p4, 1, 0 }
   0xe   : > { %s786_s20 = scalar_select %p598_p6, 1, 0 }
   0xf   : > { %p603_p8 = pnand %p310_p5, %p113_p7  ;;  %s31_s22 = sadd.s32 1, %s525_s13 }
  0x10   : > { %p617_p12 = scmp.ge.s32.totalorder %s31_s22, 2  ;;  %s61_s25 = sadd.s32 1, %s517_s11 }
  0x11   : > { %p335_p10 = pneg %p603_p8  ;;  %p68_p13 = scmp.ne.s32.totalorder %s517_s11, %s513_s10 }
  0x12   : > { %p69_p0 = scmp.eq.s32.totalorder %s529_s14, 0  ;;  %s400_s28 = scalar_lea.hbm %s776_s0, 16 }
  0x13   : > { %p613_p11 = pnand %p335_p10, %p583_p1  ;;  %p401_p3 = scmp.ne.s32.totalorder %s776_s0, %s400_s28 }
  0x14   : > { %p407_p9 = scmp.lt.u32.totalorder %s400_s28, %s776_s0 }
  0x15   : > { %p402_p5 = pneg %p613_p11 }
  0x17   : > { %p403_p7 = pnand %p402_p5, %p401_p3 }
  0x19   : > { %p404_p10 = pneg %p403_p7 }
  0x1b   : > { %p409_p6 = pnand %p407_p9, %p404_p10 }
  0x1d   : > { %412 = shalt.err (!%p409_p6)
}
  0x1e   : > { %s531_s5 = smov [#allocation2]   ;;  %s804_s22 = smov (%p617_p12, %s31_s22), 0 }
  0x1f   : > { %338 = dma.hbm_to_smem (!%p613_p11), %s776_s0, 16, %s531_s5, [#allocation5]  }
  0x20   : > { %p648_p6 = por %p69_p0, %p68_p13  ;;  %p657_p9 = por %p587_p2, %p68_p13 }
  0x21   : > { %s56_s16 = ssub.s32 %s525_s13, %s804_s22  ;;  %p348_p3 = scmp.lt.s32.totalorder %s529_s14, 2 }
  0x22   : > { %s791_s15 = scalar_select %p657_p9, 1, 0 }
  0x23   : > { %p59_p5 = scmp.eq.s32.totalorder %s56_s16, 0  ;;  %s135_s23 = sand.u32 1, %s517_s11  }
  0x24   : > { %s313_s24 = sshll.u32 %s135_s23, 3  ;;  %s325_s27 = sshll.u32 %s525_s13, 7 }
  0x25   : > { %s666_s26 = scalar_select %p59_p5, %s517_s11, %s61_s25  }
  0x26   : > { %s672_s30 = scalar_lea.hbm %s777_s1, %s325_s27  ;;  %s139_s18 = scalar_lea.vmem [#allocation6], %s313_s24 }
  0x27   : > { %s149_s3 = sshll.u32 %s139_s18, 4  ;;  %p678_p2 = pnand %p348_p3, %p648_p6  ;;  %s674_s3 = int_to_ptr.vmem [resolvable:$true] %s149_s3 }
  0x28   : > { %s136_s25 = scalar_lea.sflag [#allocation3], %s135_s23  ;;  %s413_s5 = scalar_lea.hbm %s672_s30, 128 }
  0x29   : > { %p414_p11 = scmp.ne.s32.totalorder %s672_s30, %s413_s5  ;;  %p415_p12 = pneg %p678_p2 }
  0x2a   : > { %s418_s16 = scalar_lea.hbm %s777_s1, 256  ;;  %p419_p7 = scmp.lt.u32.totalorder %s672_s30, %s777_s1 }
  0x2b   : > { %p416_p13 = pnand %p415_p12, %p414_p11  ;;  %p420_p10 = scmp.lt.u32.totalorder %s418_s16, %s413_s5 }
  0x2c   : > { %p422_p3 = scmp.lt.u32.totalorder %s413_s5, %s672_s30 }
  0x2d   : > { %p417_p0 = pneg %p416_p13  ;;  %p421_p6 = por %p420_p10, %p419_p7 }
  0x2f   : > { %p423_p5 = por %p422_p3, %p421_p6 }
  0x31   : > { %p424_p9 = pnand %p423_p5, %p417_p0 }
  0x33   : > { %427 = shalt.err (!%p424_p9)
}
  0x34   : > { %s428_s23 = scalar_lea.vmem %s674_s3, 128  ;;  %s532_s27 = smov [#allocation6]  }
  0x35   : > { %p429_p11 = scmp.ne.s32.totalorder %s674_s3, %s428_s23  ;;  %s433_s28 = sshll.u32 %s532_s27, 4  ;;  %s434_s28 = int_to_ptr.vmem [resolvable:$false] %s433_s28 }
  0x36   : > { %s435_s29 = scalar_lea.vmem %s434_s28, 256  ;;  %p436_p1 = scmp.lt.s32.totalorder %s674_s3, %s434_s28 }
  0x37   : > { %p431_p13 = pnand %p429_p11, %p415_p12  ;;  %p437_p7 = scmp.lt.s32.totalorder %s435_s29, %s428_s23 }
  0x39   : > { %p432_p4 = pneg %p431_p13  ;;  %p438_p10 = por %p437_p7, %p436_p1 }
  0x3b   : > { %p439_p6 = pnand %p438_p10, %p432_p4 }
  0x3d   : > { %442 = shalt.err (!%p439_p6)
}
  0x3e   : > { %342 = dma.hbm_to_vmem [thread:$0]  (!%p678_p2), %s672_s30, 128, %s674_s3, %s136_s25  }
  0x3f   : > { %158 = sbr.rel (%p603_p8) target bundleno = 103 (0x67), region = 28  ;;  %p793_p9 = scmp.ne.s32.totalorder (!%p603_p8), %s783_s17, 0 }
  0x46   : > { %496 = dma.done.wait (%p793_p9), [#allocation5], 16  }
  0x47   : > { %498 = vsyncadd (%p793_p9), [#allocation5], 4294967280  ;;  %s714_s18 = sand.u32 1, %s513_s10   ;;  %p794_p1 = scmp.ne.s32.totalorder %s785_s19, 0 }
  0x48   : > { %s318_s5 = sshll.u32 %s714_s18, 3  ;;  %s165_s4 = scalar_lea.sflag [#allocation3], %s714_s18 }
  0x49   : > { %s168_s6 = scalar_lea.vmem [#allocation6], %s318_s5 }
  0x4a   : > { %500 = dma.done.wait (%p794_p1), %s165_s4, 128  }
  0x4b   : > { %502 = vsyncadd (%p794_p1), %s165_s4, 4294967168 }
  0x4c   : > { %173 = sfence }
  0x4d   : > { %s190_s17 = sld [smem:[#allocation2 + %s521_s12]]  ;;  %v191_v0 = vld [vmem:[%s168_s6] sm:$0xff]  ;;  %s189_s21 = scalar_lea.vmem [#allocation7], %s318_s5 }
  0x4e   : > { %s212_s30 = sshll.u32 %s189_s21, 4  ;;  %s326_s3 = sshll.u32 %s521_s12, 7  ;;  %s724_s30 = int_to_ptr.vmem [resolvable:$true] %s212_s30 }
  0x4f   : > { %s729_s19 = scalar_lea.hbm %s778_s2, %s326_s3  ;;  %s196_s16 = scalar_lea.sflag [#allocation4], %s714_s18 }
  0x50   : > { %s443_s8 = scalar_lea.vmem %s724_s30, 128  ;;  %p795_p8 = scmp.ne.s32.totalorder %s791_s15, 0 }
  0x51   : > { %p444_p4 = scmp.ne.s32.totalorder %s724_s30, %s443_s8  ;;  %s533_s12 = smov [#allocation7]  }
  0x52   : > { %s447_s24 = sshll.u32 %s533_s12, 4  ;;  %s448_s24 = int_to_ptr.vmem [resolvable:$false] %s447_s24 }
  0x53   : > { %v192_v1 = vstv %s190_s17  ;;  %p445_p2 = pnand %p444_p4, %p795_p8  ;;  %s449_s23 = scalar_lea.vmem %s448_s24, 256 }
  0x54   : > { %v193_v2 = vmul.f32 %v192_v1, %v191_v0  ;;  %p450_p0 = scmp.lt.s32.totalorder %s724_s30, %s448_s24  ;;  %p451_p3 = scmp.lt.s32.totalorder %s449_s23, %s443_s8 }
  0x55   : > { %p446_p12 = pneg %p445_p2 }
  0x56   : > { %194 = vst [vmem:[%s189_s21] sm:$0xff] %v193_v2  ;;  %p452_p5 = por %p451_p3, %p450_p0 }
  0x58   : > { %p453_p11 = pnand %p452_p5, %p446_p12 }
  0x5a   : > { %456 = shalt.err (!%p453_p11)
}
  0x5b   : > { %s457_s27 = scalar_lea.hbm %s729_s19, 128  ;;  %s461_s18 = scalar_lea.hbm %s778_s2, 256 }
  0x5c   : > { %p458_p13 = scmp.ne.s32.totalorder %s729_s19, %s457_s27  ;;  %p462_p6 = scmp.lt.u32.totalorder %s729_s19, %s778_s2 }
  0x5d   : > { %p463_p9 = scmp.lt.u32.totalorder %s461_s18, %s457_s27  ;;  %p465_p4 = scmp.lt.u32.totalorder %s457_s27, %s729_s19 }
  0x5e   : > { %p459_p7 = pnand %p458_p13, %p795_p8 }
  0x5f   : > { %p464_p1 = por %p463_p9, %p462_p6 }
  0x60   : > { %p460_p10 = pneg %p459_p7 }
  0x61   : > { %p466_p2 = por %p465_p4, %p464_p1 }
  0x63   : > { %p467_p12 = pnand %p466_p2, %p460_p10 }
  0x65   : > { %470 = shalt.err (!%p467_p12)
}
  0x66   : > { %333 = dma.vmem_to_hbm [thread:$0]  (%p795_p8), %s724_s30, 128, %s729_s19, %s196_s16  }
  0x67 PF: > { %s224_s6 = sand.u32 1, %s509_s9   ;;  %p796_p0 = scmp.ne.s32.totalorder %s786_s20, 0 }
  0x68   : > { %p797_p3 = scmp.ge.s32.totalorder %s529_s14, 2  ;;  %s225_s17 = scalar_lea.sflag [#allocation4], %s224_s6 }
  0x6a   : > { %p344_p5 = pnand %p797_p3, %p796_p0 }
  0x6c   : > { %504 = dma.done.wait (!%p344_p5), %s225_s17, 128  }
  0x6d   : > { %506 = vsyncadd (!%p344_p5), %s225_s17, 4294967168  ;;  %s19_s14 = sadd.s32 1, %s529_s14   ;;  %s798_s9 = smov %s513_s10 }
  0x6e   : > { %p16_p11 = scmp.ge.s32.totalorder %s19_s14, 4   ;;  %s799_s10 = smov %s517_s11 }
  0x6f   : > { %s800_s11 = smov %s666_s26  ;;  %s801_s12 = smov %s525_s13 }
  0x70   : > { %s802_s13 = smov %s804_s22  ;;  %18 = sbr.rel (!%p16_p11) target bundleno = 7 (0x7), region = 78 }
  0x77   :  { %230 = vsyncpa [#allocation3], 1 }
  0x78   :  { %232 = vsyncpa [#allocation3 + $0x1], 1 }
  0x79   :  { %233 = vsyncpa [#allocation4], 1 }
  0x7a   :  { %235 = vsyncpa [#allocation4 + $0x1], 1 }
  0x7b   :  { %236 = vsyncpa [#allocation5], 1 }
  0x7c   :  { %238 = vsyncpa [#allocation5 + $0x1], 1 }

</bundles_post_ra>
